<compile_context>
chip_gen: v7x
topology: tpu7x:2x2x1
jax: 0.10.0
libtpu: 0.0.40
codegen_flags: <defaults>
</compile_context>

<pallas_src>
import functools

import jax
import jax.numpy as jnp
from jax import lax
from jax.experimental import pallas as pl
from jax.experimental.pallas import tpu as pltpu


# ----------------------------------------------------------------------------
# Fused Pallas kernel: all SAGE layers + MLP head, single grid step
# ----------------------------------------------------------------------------
def _fused_kernel(a_ref, x_ref, wcat_ref, bl_ref,
                  d_ref, w1_ref, b1_ref, w2_ref, b2_ref,
                  wpred_ref, out_ref):
    """Per layer l (unrolled at trace time):
        hw  = H @ [Wl | Wr]                       (one lane-wide bf16 matmul)
        out = A @ hw[:, :F]  +  hw[:, F:]  +  bl  (reassociated (A@H)@Wl)
        H   = out * rsqrt(max(sum(out^2), 1e-24)) (== F.normalize(out, dim=-1))
    Then the MLP head: sigmoid(Linear2(relu(Linear1(data)))).
    """
    h = x_ref[...]                               # (N, F) f32
    fp = h.shape[-1]
    n_layers = wcat_ref.shape[0]                 # static
    a_bf = a_ref[...]                            # (N, N) bf16, loaded once

    for l in range(n_layers):                    # unrolled: LLO sees all layers
        hw = jnp.dot(h.astype(jnp.bfloat16), wcat_ref[l],
                     preferred_element_type=jnp.float32)      # (N, 2F)
        h_l = hw[:, :fp]                                       # H @ Wl
        h_r = hw[:, fp:]                                       # H @ Wr
        agg = jnp.dot(a_bf, h_l.astype(jnp.bfloat16),
                      preferred_element_type=jnp.float32)      # A @ (H Wl)
        out = agg + h_r + bl_ref[l]
        ss = jnp.sum(out * out, axis=-1, keepdims=True)
        h = out * lax.rsqrt(jnp.maximum(ss, 1e-24))            # rsqrt -> EUP

    wpred_ref[...] = h

    # MLP head (zero extra kernel launches).
    t = jnp.dot(d_ref[...], w1_ref[...], preferred_element_type=jnp.float32)
    t = jnp.maximum(t + b1_ref[...], 0.0)
    o = jnp.dot(t.astype(jnp.bfloat16), w2_ref[...],
                preferred_element_type=jnp.float32) + b2_ref[...]
    out_ref[...] = jax.nn.sigmoid(o)


def _vmem_limit_bytes():
    """Generation-aware VMEM budget (v5e/v6e: 128 MiB physical, v7x: 64 MiB)."""
    try:
        cap = pltpu.get_tpu_info().vmem_capacity_bytes
    except Exception:
        cap = 64 * 1024 * 1024
    return max(32 * 1024 * 1024, min(int(cap * 3 // 4), 100 * 1024 * 1024))


def _fused_forward(adj, x, wcat, bl, data, w1, b1, w2, b2):
    n_pad, fp = x.shape
    b_pad = data.shape[0]
    hp = w1.shape[1]
    op = w2.shape[1]
    layers = wcat.shape[0]

    full2 = lambda i: (0, 0)          # constant block -> VMEM-resident, one DMA
    full3 = lambda i: (0, 0, 0)

    flops = int(2 * layers * (n_pad * fp * 2 * fp + n_pad * n_pad * fp)
                + 2 * b_pad * (fp * hp + hp * op))
    transcendentals = int(layers * n_pad + b_pad * op)
    bytes_accessed = int(adj.size * 2 + x.size * 4 + wcat.size * 2
                         + bl.size * 4 + data.size * 2 + w1.size * 2
                         + b1.size * 4 + w2.size * 2 + b2.size * 4
                         + n_pad * fp * 4 + b_pad * op * 4)

    return pl.pallas_call(
        _fused_kernel,
        out_shape=(jax.ShapeDtypeStruct((n_pad, fp), jnp.float32),
                   jax.ShapeDtypeStruct((b_pad, op), jnp.float32)),
        grid_spec=pltpu.PrefetchScalarGridSpec(
            num_scalar_prefetch=0,
            grid=(1,),                                          # single step
            in_specs=[
                pl.BlockSpec((n_pad, n_pad), full2),            # adjacency
                pl.BlockSpec((n_pad, fp), full2),               # x (initial H)
                pl.BlockSpec((layers, fp, 2 * fp), full3),      # all [Wl | Wr]
                pl.BlockSpec((layers, 1, fp), full3),           # all bl
                pl.BlockSpec((b_pad, fp), full2),               # data (MLP in)
                pl.BlockSpec((fp, hp), full2),                  # w1
                pl.BlockSpec((1, hp), full2),                   # b1
                pl.BlockSpec((hp, op), full2),                  # w2
                pl.BlockSpec((1, op), full2),                   # b2
            ],
            out_specs=(
                pl.BlockSpec((n_pad, fp), full2),               # w_pred
                pl.BlockSpec((b_pad, op), full2),               # mlp output
            ),
        ),
        compiler_params=pltpu.CompilerParams(
            dimension_semantics=("arbitrary",),
            vmem_limit_bytes=_vmem_limit_bytes(),
        ),
        cost_estimate=pl.CostEstimate(
            flops=flops,
            transcendentals=transcendentals,
            bytes_accessed=bytes_accessed,
        ),
    )(adj, x, wcat, bl, data, w1, b1, w2, b2)


# ----------------------------------------------------------------------------
# Plain-JAX glue
# ----------------------------------------------------------------------------
def _round_up(v, m):
    return (v + m - 1) // m * m


def _pad2(a, rows, cols):
    r, c = a.shape
    return jnp.pad(a, ((0, rows - r), (0, cols - c)))


def build_mean_adjacency(edge_index, num_nodes):
    """Dense mean-aggregation operator: A[i, j] = 1/deg_in(i) if edge j -> i."""
    src = edge_index[0]
    dst = edge_index[1]
    a = jnp.zeros((num_nodes, num_nodes), jnp.float32)
    a = a.at[dst, src].add(1.0)
    deg = jnp.maximum(jnp.sum(a, axis=1, keepdims=True), 1.0)
    return a / deg


def pack_params(params, in_features, hidden=32, out_dim=2):
    """One-time weight staging (hoisted out of the forward path).

    Conv weights are zero-padded to lane-dense 128 multiples, Wl/Wr are
    concatenated into one (F, 2F) matrix per layer, and everything feeding the
    MXU is cast to bf16 (f32 accumulation happens in the kernel).
    """
    fp = _round_up(in_features, 128)
    hp = _round_up(hidden, 128)
    op = _round_up(out_dim, 128)

    wcats, bls = [], []
    for (w_l, b_l, w_r) in params["convs"]:
        wl = _pad2(w_l, fp, fp)
        wr = _pad2(w_r, fp, fp)
        wcats.append(jnp.concatenate([wl, wr], axis=1))      # (fp, 2*fp)
        bls.append(_pad2(b_l, 1, fp))

    return {
        "wcat": jnp.stack(wcats).astype(jnp.bfloat16),       # (L, fp, 2fp)
        "bl": jnp.stack(bls).astype(jnp.float32),            # (L, 1, fp)
        "w1": _pad2(params["w1"], fp, hp).astype(jnp.bfloat16),
        "b1": _pad2(params["b1"], 1, hp).astype(jnp.float32),
        "w2": _pad2(params["w2"], hp, op).astype(jnp.bfloat16),
        "b2": _pad2(params["b2"], 1, op).astype(jnp.float32),
        "dims": (in_features, hidden, out_dim, fp, hp, op),
    }


def prepare_graph(x, edge_index, packed):
    """One-time (per static graph) adjacency build + padding + bf16 cast.

    Hoisted out of the per-forward path: the O(N^2) scatter-add and the N^2
    HBM round trip no longer run every call.
    """
    fp = packed["dims"][3]
    n = x.shape[0]
    n_pad = _round_up(max(n, 128), 128)        # lane/K dim of A -> 128-aligned
    adj = build_mean_adjacency(edge_index, n)
    adj_pad = _pad2(adj, n_pad, n_pad).astype(jnp.bfloat16)
    x_pad = _pad2(x, n_pad, fp).astype(jnp.float32)
    return adj_pad, x_pad


def graph_model_forward(packed, num_nodes, adj_pad, x_pad, data):
    """Mirrors GraphModel.forward: returns (w_pred, output)."""
    in_features, _hidden, out_dim, fp, _hp, _op = packed["dims"]
    b = data.shape[0]
    b_pad = _round_up(max(b, 16), 16)          # bf16 sublane packing (16 rows)
    d_pad = _pad2(data, b_pad, fp).astype(jnp.bfloat16)

    w_pred_pad, out_pad = _fused_forward(
        adj_pad, x_pad, packed["wcat"], packed["bl"],
        d_pad, packed["w1"], packed["b1"], packed["w2"], packed["b2"])

    return w_pred_pad[:num_nodes, :in_features], out_pad[:b, :out_dim]


# ----------------------------------------------------------------------------
# Deterministic parameter construction
# ----------------------------------------------------------------------------
def init_params(key, layer_num, in_features, hidden=32, out_dim=2):
    params = {"convs": []}
    for i in range(layer_num):
        k1, k2, key = jax.random.split(key, 3)
        # stored already transposed: h @ W  (PyTorch lin(h) = h @ W^T)
        w_l = jax.random.normal(k1, (in_features, in_features), jnp.float32) * 0.1
        b_l = jnp.full((1, in_features), 0.01 * (i + 1), jnp.float32)
        w_r = jax.random.normal(k2, (in_features, in_features), jnp.float32) * 0.1
        params["convs"].append((w_l, b_l, w_r))

    k1, k2, key = jax.random.split(key, 3)
    params["w1"] = jax.random.normal(k1, (in_features, hidden), jnp.float32) * 0.1
    params["b1"] = jnp.full((1, hidden), 0.02, jnp.float32)
    params["w2"] = jax.random.normal(k2, (hidden, out_dim), jnp.float32) * 0.1
    params["b2"] = jnp.full((1, out_dim), -0.01, jnp.float32)
    return params


# ----------------------------------------------------------------------------
if __name__ == "__main__":
    layer_num = 2
    in_features = 32
    num_nodes = 16
    num_edges = 48
    batch = 8

    key = jax.random.PRNGKey(0)
    k_x, k_e, k_d, k_p = jax.random.split(key, 4)

    x = jax.random.normal(k_x, (num_nodes, in_features), jnp.float32)
    edge_index = jax.random.randint(k_e, (2, num_edges), 0, num_nodes, jnp.int32)
    data = jax.random.normal(k_d, (batch, in_features), jnp.float32)

    params = init_params(k_p, layer_num, in_features)
    packed = pack_params(params, in_features)          # weight staging, once
    adj_pad, x_pad = prepare_graph(x, edge_index, packed)  # adjacency, once

    fwd = jax.jit(functools.partial(graph_model_forward, packed, num_nodes))
    w_pred, output = fwd(adj_pad, x_pad, data)
    jax.block_until_ready((w_pred, output))

    assert w_pred.shape == (num_nodes, in_features)
    assert output.shape == (batch, 2)
    print("KERNEL_OK")
</pallas_src>

<mosaic_0001>
module attributes {stable_mosaic.version = 11 : i64} {
  func.func @_fused_kernel(%arg0: i32, %arg1: memref<128x128xbf16, #tpu.memory_space<vmem>>, %arg2: memref<128x128xf32, #tpu.memory_space<vmem>>, %arg3: memref<2x128x256xbf16, #tpu.memory_space<vmem>>, %arg4: memref<2x1x128xf32, #tpu.memory_space<vmem>>, %arg5: memref<16x128xbf16, #tpu.memory_space<vmem>>, %arg6: memref<128x128xbf16, #tpu.memory_space<vmem>>, %arg7: memref<1x128xf32, #tpu.memory_space<vmem>>, %arg8: memref<128x128xbf16, #tpu.memory_space<vmem>>, %arg9: memref<1x128xf32, #tpu.memory_space<vmem>>, %arg10: memref<128x128xf32, #tpu.memory_space<vmem>>, %arg11: memref<16x128xf32, #tpu.memory_space<vmem>>) attributes {dimension_semantics = [#tpu.dimension_semantics<arbitrary>], iteration_bounds = array<i64: 1>, scalar_prefetch = 0 : i64, scratch_operands = 0 : i64, tpu.core_type = #tpu.core_type<tc>, window_params = [{pipeline_mode = #tpu.pipeline_mode<synchronous>, transform_indices = @transform_0, window_bounds = array<i64: 128, 128>}, {pipeline_mode = #tpu.pipeline_mode<synchronous>, transform_indices = @transform_1, window_bounds = array<i64: 128, 128>}, {pipeline_mode = #tpu.pipeline_mode<synchronous>, transform_indices = @transform_2, window_bounds = array<i64: 2, 128, 256>}, {pipeline_mode = #tpu.pipeline_mode<synchronous>, transform_indices = @transform_3, window_bounds = array<i64: 2, 1, 128>}, {pipeline_mode = #tpu.pipeline_mode<synchronous>, transform_indices = @transform_4, window_bounds = array<i64: 16, 128>}, {pipeline_mode = #tpu.pipeline_mode<synchronous>, transform_indices = @transform_5, window_bounds = array<i64: 128, 128>}, {pipeline_mode = #tpu.pipeline_mode<synchronous>, transform_indices = @transform_6, window_bounds = array<i64: 1, 128>}, {pipeline_mode = #tpu.pipeline_mode<synchronous>, transform_indices = @transform_7, window_bounds = array<i64: 128, 128>}, {pipeline_mode = #tpu.pipeline_mode<synchronous>, transform_indices = @transform_8, window_bounds = array<i64: 1, 128>}, {pipeline_mode = #tpu.pipeline_mode<synchronous>, transform_indices = @transform_9, window_bounds = array<i64: 128, 128>}, {pipeline_mode = #tpu.pipeline_mode<synchronous>, transform_indices = @transform_10, window_bounds = array<i64: 16, 128>}]} {
    %c0 = arith.constant 0 : index
    %c0_0 = arith.constant 0 : index
    %0 = vector.load %arg2[%c0, %c0_0] : memref<128x128xf32, #tpu.memory_space<vmem>>, vector<128x128xf32>
    %c0_1 = arith.constant 0 : index
    %c0_2 = arith.constant 0 : index
    %1 = vector.load %arg1[%c0_1, %c0_2] : memref<128x128xbf16, #tpu.memory_space<vmem>>, vector<128x128xbf16>
    %2 = arith.truncf %0 : vector<128x128xf32> to vector<128x128xbf16>
    %c0_3 = arith.constant 0 : index
    %c0_4 = arith.constant 0 : index
    %c0_5 = arith.constant 0 : index
    %3 = vector.load %arg3[%c0_3, %c0_4, %c0_5] : memref<2x128x256xbf16, #tpu.memory_space<vmem>>, vector<1x128x256xbf16>
    %4 = vector.shape_cast %3 : vector<1x128x256xbf16> to vector<128x256xbf16>
    %cst = arith.constant dense<0.000000e+00> : vector<128x256xf32>
    %5 = tpu.matmul %2, %4, %cst {dimension_numbers = #tpu.dot_dimension_numbers<[1], [0], [0], [1], [0, 0, 1, 1], [], []>} : vector<128x128xbf16>, vector<128x256xbf16>, vector<128x256xf32> -> vector<128x256xf32>
    %6 = vector.extract_strided_slice %5 {offsets = [0, 0], sizes = [128, 128], strides = [1, 1]} : vector<128x256xf32> to vector<128x128xf32>
    %7 = vector.extract_strided_slice %5 {offsets = [0, 128], sizes = [128, 128], strides = [1, 1]} : vector<128x256xf32> to vector<128x128xf32>
    %8 = arith.truncf %6 : vector<128x128xf32> to vector<128x128xbf16>
    %cst_6 = arith.constant dense<0.000000e+00> : vector<128x128xf32>
    %9 = tpu.matmul %1, %8, %cst_6 {dimension_numbers = #tpu.dot_dimension_numbers<[1], [0], [0], [1], [0, 0, 1, 1], [], []>} : vector<128x128xbf16>, vector<128x128xbf16>, vector<128x128xf32> -> vector<128x128xf32>
    %10 = arith.addf %9, %7 : vector<128x128xf32>
    %c0_7 = arith.constant 0 : index
    %c0_8 = arith.constant 0 : index
    %c0_9 = arith.constant 0 : index
    %11 = vector.load %arg4[%c0_7, %c0_8, %c0_9] : memref<2x1x128xf32, #tpu.memory_space<vmem>>, vector<1x1x128xf32>
    %12 = vector.shape_cast %11 : vector<1x1x128xf32> to vector<1x128xf32>
    %13 = vector.broadcast %12 : vector<1x128xf32> to vector<128x128xf32>
    %14 = arith.addf %10, %13 : vector<128x128xf32>
    %15 = arith.mulf %14, %14 : vector<128x128xf32>
    %cst_10 = arith.constant dense<0.000000e+00> : vector<128xf32>
    %16 = vector.multi_reduction <add>, %15, %cst_10 [1] : vector<128x128xf32> to vector<128xf32>
    %17 = vector.shape_cast %16 : vector<128xf32> to vector<128x1xf32>
    %cst_11 = arith.constant 1.000000e-24 : f32
    %18 = vector.broadcast %cst_11 : f32 to vector<128x1xf32>
    %19 = arith.maximumf %17, %18 : vector<128x1xf32>
    %20 = math.rsqrt %19 : vector<128x1xf32>
    %21 = vector.broadcast %20 : vector<128x1xf32> to vector<128x128xf32>
    %22 = arith.mulf %14, %21 : vector<128x128xf32>
    %23 = arith.truncf %22 : vector<128x128xf32> to vector<128x128xbf16>
    %c1 = arith.constant 1 : index
    %c0_12 = arith.constant 0 : index
    %c0_13 = arith.constant 0 : index
    %24 = vector.load %arg3[%c1, %c0_12, %c0_13] : memref<2x128x256xbf16, #tpu.memory_space<vmem>>, vector<1x128x256xbf16>
    %25 = vector.shape_cast %24 : vector<1x128x256xbf16> to vector<128x256xbf16>
    %cst_14 = arith.constant dense<0.000000e+00> : vector<128x256xf32>
    %26 = tpu.matmul %23, %25, %cst_14 {dimension_numbers = #tpu.dot_dimension_numbers<[1], [0], [0], [1], [0, 0, 1, 1], [], []>} : vector<128x128xbf16>, vector<128x256xbf16>, vector<128x256xf32> -> vector<128x256xf32>
    %27 = vector.extract_strided_slice %26 {offsets = [0, 0], sizes = [128, 128], strides = [1, 1]} : vector<128x256xf32> to vector<128x128xf32>
    %28 = vector.extract_strided_slice %26 {offsets = [0, 128], sizes = [128, 128], strides = [1, 1]} : vector<128x256xf32> to vector<128x128xf32>
    %29 = arith.truncf %27 : vector<128x128xf32> to vector<128x128xbf16>
    %cst_15 = arith.constant dense<0.000000e+00> : vector<128x128xf32>
    %30 = tpu.matmul %1, %29, %cst_15 {dimension_numbers = #tpu.dot_dimension_numbers<[1], [0], [0], [1], [0, 0, 1, 1], [], []>} : vector<128x128xbf16>, vector<128x128xbf16>, vector<128x128xf32> -> vector<128x128xf32>
    %31 = arith.addf %30, %28 : vector<128x128xf32>
    %c1_16 = arith.constant 1 : index
    %c0_17 = arith.constant 0 : index
    %c0_18 = arith.constant 0 : index
    %32 = vector.load %arg4[%c1_16, %c0_17, %c0_18] : memref<2x1x128xf32, #tpu.memory_space<vmem>>, vector<1x1x128xf32>
    %33 = vector.shape_cast %32 : vector<1x1x128xf32> to vector<1x128xf32>
    %34 = vector.broadcast %33 : vector<1x128xf32> to vector<128x128xf32>
    %35 = arith.addf %31, %34 : vector<128x128xf32>
    %36 = arith.mulf %35, %35 : vector<128x128xf32>
    %cst_19 = arith.constant dense<0.000000e+00> : vector<128xf32>
    %37 = vector.multi_reduction <add>, %36, %cst_19 [1] : vector<128x128xf32> to vector<128xf32>
    %38 = vector.shape_cast %37 : vector<128xf32> to vector<128x1xf32>
    %cst_20 = arith.constant 1.000000e-24 : f32
    %39 = vector.broadcast %cst_20 : f32 to vector<128x1xf32>
    %40 = arith.maximumf %38, %39 : vector<128x1xf32>
    %41 = math.rsqrt %40 : vector<128x1xf32>
    %42 = vector.broadcast %41 : vector<128x1xf32> to vector<128x128xf32>
    %43 = arith.mulf %35, %42 : vector<128x128xf32>
    %c0_21 = arith.constant 0 : index
    %c0_22 = arith.constant 0 : index
    %44 = vector.load %arg10[%c0_21, %c0_22] : memref<128x128xf32, #tpu.memory_space<vmem>>, vector<128x128xf32>
    tpu.vector_store %arg10[%c0_21, %c0_22], %43 {strides = array<i32>} : memref<128x128xf32, #tpu.memory_space<vmem>>, vector<128x128xf32>,
    %c0_23 = arith.constant 0 : index
    %c0_24 = arith.constant 0 : index
    %45 = vector.load %arg5[%c0_23, %c0_24] : memref<16x128xbf16, #tpu.memory_space<vmem>>, vector<16x128xbf16>
    %c0_25 = arith.constant 0 : index
    %c0_26 = arith.constant 0 : index
    %46 = vector.load %arg6[%c0_25, %c0_26] : memref<128x128xbf16, #tpu.memory_space<vmem>>, vector<128x128xbf16>
    %cst_27 = arith.constant dense<0.000000e+00> : vector<16x128xf32>
    %47 = tpu.matmul %45, %46, %cst_27 {dimension_numbers = #tpu.dot_dimension_numbers<[1], [0], [0], [1], [0, 0, 1, 1], [], []>} : vector<16x128xbf16>, vector<128x128xbf16>, vector<16x128xf32> -> vector<16x128xf32>
    %c0_28 = arith.constant 0 : index
    %c0_29 = arith.constant 0 : index
    %48 = vector.load %arg7[%c0_28, %c0_29] : memref<1x128xf32, #tpu.memory_space<vmem>>, vector<1x128xf32>
    %49 = vector.broadcast %48 : vector<1x128xf32> to vector<16x128xf32>
    %50 = arith.addf %47, %49 : vector<16x128xf32>
    %cst_30 = arith.constant 0.000000e+00 : f32
    %51 = vector.broadcast %cst_30 : f32 to vector<16x128xf32>
    %52 = arith.maximumf %50, %51 : vector<16x128xf32>
    %53 = arith.truncf %52 : vector<16x128xf32> to vector<16x128xbf16>
    %c0_31 = arith.constant 0 : index
    %c0_32 = arith.constant 0 : index
    %54 = vector.load %arg8[%c0_31, %c0_32] : memref<128x128xbf16, #tpu.memory_space<vmem>>, vector<128x128xbf16>
    %cst_33 = arith.constant dense<0.000000e+00> : vector<16x128xf32>
    %55 = tpu.matmul %53, %54, %cst_33 {dimension_numbers = #tpu.dot_dimension_numbers<[1], [0], [0], [1], [0, 0, 1, 1], [], []>} : vector<16x128xbf16>, vector<128x128xbf16>, vector<16x128xf32> -> vector<16x128xf32>
    %c0_34 = arith.constant 0 : index
    %c0_35 = arith.constant 0 : index
    %56 = vector.load %arg9[%c0_34, %c0_35] : memref<1x128xf32, #tpu.memory_space<vmem>>, vector<1x128xf32>
    %57 = vector.broadcast %56 : vector<1x128xf32> to vector<16x128xf32>
    %58 = arith.addf %55, %57 : vector<16x128xf32>
    %59 = arith.negf %58 : vector<16x128xf32>
    %60 = math.exp %59 : vector<16x128xf32>
    %cst_36 = arith.constant 1.000000e+00 : f32
    %61 = vector.broadcast %cst_36 : f32 to vector<16x128xf32>
    %62 = arith.addf %61, %60 : vector<16x128xf32>
    %63 = arith.divf %61, %62 : vector<16x128xf32>
    %c0_37 = arith.constant 0 : index
    %c0_38 = arith.constant 0 : index
    %64 = vector.load %arg11[%c0_37, %c0_38] : memref<16x128xf32, #tpu.memory_space<vmem>>, vector<16x128xf32>
    tpu.vector_store %arg11[%c0_37, %c0_38], %63 {strides = array<i32>} : memref<16x128xf32, #tpu.memory_space<vmem>>, vector<16x128xf32>,
    return
  }
  func.func @transform_0(%arg0: i32) -> (i32, i32) {
    %c0_i32 = arith.constant 0 : i32
    %c0_i32_0 = arith.constant 0 : i32
    %c0_i32_1 = arith.constant 0 : i32
    return %c0_i32, %c0_i32_0 : i32, i32
  }
  func.func @transform_1(%arg0: i32) -> (i32, i32) {
    %c0_i32 = arith.constant 0 : i32
    %c0_i32_0 = arith.constant 0 : i32
    %c0_i32_1 = arith.constant 0 : i32
    return %c0_i32, %c0_i32_0 : i32, i32
  }
  func.func @transform_2(%arg0: i32) -> (i32, i32, i32) {
    %c0_i32 = arith.constant 0 : i32
    %c0_i32_0 = arith.constant 0 : i32
    %c0_i32_1 = arith.constant 0 : i32
    %c0_i32_2 = arith.constant 0 : i32
    return %c0_i32, %c0_i32_0, %c0_i32_1 : i32, i32, i32
  }
  func.func @transform_3(%arg0: i32) -> (i32, i32, i32) {
    %c0_i32 = arith.constant 0 : i32
    %c0_i32_0 = arith.constant 0 : i32
    %c0_i32_1 = arith.constant 0 : i32
    %c0_i32_2 = arith.constant 0 : i32
    return %c0_i32, %c0_i32_0, %c0_i32_1 : i32, i32, i32
  }
  func.func @transform_4(%arg0: i32) -> (i32, i32) {
    %c0_i32 = arith.constant 0 : i32
    %c0_i32_0 = arith.constant 0 : i32
    %c0_i32_1 = arith.constant 0 : i32
    return %c0_i32, %c0_i32_0 : i32, i32
  }
  func.func @transform_5(%arg0: i32) -> (i32, i32) {
    %c0_i32 = arith.constant 0 : i32
    %c0_i32_0 = arith.constant 0 : i32
    %c0_i32_1 = arith.constant 0 : i32
    return %c0_i32, %c0_i32_0 : i32, i32
  }
  func.func @transform_6(%arg0: i32) -> (i32, i32) {
    %c0_i32 = arith.constant 0 : i32
    %c0_i32_0 = arith.constant 0 : i32
    %c0_i32_1 = arith.constant 0 : i32
    return %c0_i32, %c0_i32_0 : i32, i32
  }
  func.func @transform_7(%arg0: i32) -> (i32, i32) {
    %c0_i32 = arith.constant 0 : i32
    %c0_i32_0 = arith.constant 0 : i32
    %c0_i32_1 = arith.constant 0 : i32
    return %c0_i32, %c0_i32_0 : i32, i32
  }
  func.func @transform_8(%arg0: i32) -> (i32, i32) {
    %c0_i32 = arith.constant 0 : i32
    %c0_i32_0 = arith.constant 0 : i32
    %c0_i32_1 = arith.constant 0 : i32
    return %c0_i32, %c0_i32_0 : i32, i32
  }
  func.func @transform_9(%arg0: i32) -> (i32, i32) {
    %c0_i32 = arith.constant 0 : i32
    %c0_i32_0 = arith.constant 0 : i32
    %c0_i32_1 = arith.constant 0 : i32
    return %c0_i32, %c0_i32_0 : i32, i32
  }
  func.func @transform_10(%arg0: i32) -> (i32, i32) {
    %c0_i32 = arith.constant 0 : i32
    %c0_i32_0 = arith.constant 0 : i32
    %c0_i32_1 = arith.constant 0 : i32
    return %c0_i32, %c0_i32_0 : i32, i32
  }
}

</mosaic_0001>

<bundles_post_ra>
// kernel: graph_model_forward.1
= control target key start
LH: loop header
LB: loop body
LE: loop exit
PB: predicated region body
PF: predicated region fallthrough
CT: control target
= control target key end

     0   :  { %v1654_v1 = vmov 0   ;;  %vm1656_vm0 = vmmov 0   ;;  %s2353_s2 = inlined_call_operand.vmem [shape: bf16[2,128,256], index: 2, kind: input, shape index: {}]   ;;  %s2354_s1 = inlined_call_operand.vmem [shape: f32[128,128], index: 1, kind: input, shape index: {}]   ;;  %s2355_s0 = inlined_call_operand.vmem [shape: bf16[128,128], index: 0, kind: input, shape index: {}]   ;;  %s2356_s3 = inlined_call_operand.vmem [shape: f32[2,1,128], index: 3, kind: input, shape index: {}]   ;;  %s2357_s5 = inlined_call_operand.vmem [shape: bf16[128,128], index: 5, kind: input, shape index: {}]   ;;  %s2358_s4 = inlined_call_operand.vmem [shape: bf16[16,128], index: 4, kind: input, shape index: {}]   ;;  %s2359_s7 = inlined_call_operand.vmem [shape: bf16[128,128], index: 7, kind: input, shape index: {}]   ;;  %s2360_s6 = inlined_call_operand.vmem [shape: f32[1,128], index: 6, kind: input, shape index: {}]   ;;  %s2361_s9 = inlined_call_operand.vmem [shape: f32[128,128], index: 9, kind: output, shape index: {0}]   ;;  %s2362_s8 = inlined_call_operand.vmem [shape: f32[1,128], index: 8, kind: input, shape index: {}]   ;;  %s2363_s10 = inlined_call_operand.vmem [shape: f32[16,128], index: 10, kind: output, shape index: {1}]  }
   0x1   :  { %v1509_v0 = vld [vmem:[%s2353_s2 + $0x4] ss:$8 sps:$4 sm:$0xff]   ;;  %203 = vmatprep.mubr.bf16.mxu0 %v1654_v1  ;;  %v1511_v2 = vld [vmem:[%s2353_s2] ss:$8 sps:$4 sm:$0xff]   ;;  %v1512_v3 = vld [vmem:[%s2353_s2 + $0x14] ss:$8 sps:$4 sm:$0xff]  }
   0x2   :  { %171 = vmatprep.subr.bf16.mxu0 %v1509_v0  ;;  %v1514_v4 = vld [vmem:[%s2353_s2 + $0x10] ss:$8 sps:$4 sm:$0xff]   ;;  %v1515_v5 = vld [vmem:[%s2353_s2 + $0x24] ss:$8 sps:$4 sm:$0xff]   ;;  %v1517_v6 = vld [vmem:[%s2353_s2 + $0x20] ss:$8 sps:$4 sm:$0xff]  }
   0x3   :  { %172 = vmatpush1.bf16.msra.mxu0 %v1511_v2  ;;  %v1518_v7 = vld [vmem:[%s2353_s2 + $0x34] ss:$8 sps:$4 sm:$0xff]   ;;  %v1520_v8 = vld [vmem:[%s2353_s2 + $0x30] ss:$8 sps:$4 sm:$0xff]   ;;  %v1521_v9 = vld [vmem:[%s2353_s2 + $0x44] ss:$8 sps:$4 sm:$0xff]  }
   0x4   :  { %173 = vmatprep.subr.bf16.mxu0 %v1512_v3  ;;  %v1523_v10 = vld [vmem:[%s2353_s2 + $0x40] ss:$8 sps:$4 sm:$0xff]   ;;  %v1524_v11 = vld [vmem:[%s2353_s2 + $0x54] ss:$8 sps:$4 sm:$0xff]   ;;  %v1526_v12 = vld [vmem:[%s2353_s2 + $0x50] ss:$8 sps:$4 sm:$0xff]  }
   0x5   :  { %v1527_v13 = vld [vmem:[%s2353_s2 + $0x64] ss:$8 sps:$4 sm:$0xff]   ;;  %v1529_v14 = vld [vmem:[%s2353_s2 + $0x60] ss:$8 sps:$4 sm:$0xff]   ;;  %v1530_v15 = vld [vmem:[%s2353_s2 + $0x74] ss:$8 sps:$4 sm:$0xff]  }
   0x6   :  { %v1532_v16 = vld [vmem:[%s2353_s2 + $0x70] ss:$8 sps:$4 sm:$0xff]   ;;  %v35_v17 = vld [vmem:[%s2354_s1] sm:$0xff]  ;;  %v36_v18 = vld [vmem:[%s2354_s1 + $0x8] sm:$0xff] }
   0x7   :  { %174 = vmatpush1.bf16.msra.mxu0 %v1514_v4  ;;  %v67_v19 = vpack.c.bf16 %v36_v18, %v35_v17  ;;  %v37_v20 = vld [vmem:[%s2354_s1 + $0x10] sm:$0xff]  ;;  %v38_v21 = vld [vmem:[%s2354_s1 + $0x18] sm:$0xff]  ;;  %v39_v23 = vld [vmem:[%s2354_s1 + $0x20] sm:$0xff] }
   0x8   :  { %175 = vmatprep.subr.bf16.mxu0 %v1515_v5  ;;  %v68_v22 = vpack.c.bf16 %v38_v21, %v37_v20  ;;  %v40_v24 = vld [vmem:[%s2354_s1 + $0x28] sm:$0xff]  ;;  %v41_v26 = vld [vmem:[%s2354_s1 + $0x30] sm:$0xff]  ;;  %v42_v27 = vld [vmem:[%s2354_s1 + $0x38] sm:$0xff] }
   0x9   :  { %v69_v25 = vpack.c.bf16 %v40_v24, %v39_v23  ;;  %v70_v28 = vpack.c.bf16 %v42_v27, %v41_v26  ;;  %v43_v29 = vld [vmem:[%s2354_s1 + $0x40] sm:$0xff]  ;;  %v44_v30 = vld [vmem:[%s2354_s1 + $0x48] sm:$0xff]  ;;  %v45_v32 = vld [vmem:[%s2354_s1 + $0x50] sm:$0xff] }
   0xa   :  { %v71_v31 = vpack.c.bf16 %v44_v30, %v43_v29  ;;  %v46_v33 = vld [vmem:[%s2354_s1 + $0x58] sm:$0xff]  ;;  %v47_v35 = vld [vmem:[%s2354_s1 + $0x60] sm:$0xff]  ;;  %v48_v36 = vld [vmem:[%s2354_s1 + $0x68] sm:$0xff] }
   0xb   :  { %176 = vmatpush1.bf16.msra.mxu0 %v1517_v6  ;;  %v72_v34 = vpack.c.bf16 %v46_v33, %v45_v32  ;;  %v73_v37 = vpack.c.bf16 %v48_v36, %v47_v35  ;;  %v49_v38 = vld [vmem:[%s2354_s1 + $0x70] sm:$0xff]  ;;  %v50_v39 = vld [vmem:[%s2354_s1 + $0x78] sm:$0xff]  ;;  %v1533_v41 = vld [vmem:[%s2355_s0] sm:$0xff]  }
   0xc   :  { %177 = vmatprep.subr.bf16.mxu0 %v1518_v7  ;;  %v74_v40 = vpack.c.bf16 %v50_v39, %v49_v38  ;;  %1418 = vmatprep.mubr.bf16.mxu1 %v1533_v41  ;;  %v1859_v20 = vld [vmem:[%s2355_s0 + $0x10] sm:$0xff]   ;;  %v1866_v21 = vld [vmem:[%s2355_s0 + $0x18] sm:$0xff]   ;;  %v1878_v23 = vld [vmem:[%s2355_s0 + $0x28] sm:$0xff]  }
   0xd   :  { %v1883_v24 = vld [vmem:[%s2355_s0 + $0x30] sm:$0xff]   ;;  %v1541_v26 = vld [vmem:[%s2353_s2 + $0x80] ss:$8 sps:$4 sm:$0xff]   ;;  %v1543_v27 = vld [vmem:[%s2353_s2 + $0x84] ss:$8 sps:$4 sm:$0xff]  }
   0xe   :  { %v1544_v29 = vld [vmem:[%s2353_s2 + $0x90] ss:$8 sps:$4 sm:$0xff]   ;;  %v1549_v30 = vld [vmem:[%s2353_s2 + $0xa4] ss:$8 sps:$4 sm:$0xff]   ;;  %v1915_v33 = vld [vmem:[%s2356_s3] ss:$0 sm:$0xff] }
   0xf   :  { %178 = vmatpush1.bf16.msra.mxu0 %v1520_v8 }
  0x10   :  { %179 = vmatprep.subr.bf16.mxu0 %v1521_v9 }
  0x13   :  { %180 = vmatpush1.bf16.msra.mxu0 %v1523_v10 }
  0x14   :  { %181 = vmatprep.subr.bf16.mxu0 %v1524_v11 }
  0x17   :  { %182 = vmatpush1.bf16.msra.mxu0 %v1526_v12 }
  0x18   :  { %183 = vmatprep.subr.bf16.mxu0 %v1527_v13 }
  0x1b   :  { %184 = vmatpush1.bf16.msra.mxu0 %v1529_v14 }
  0x1c   :  { %185 = vmatprep.subr.bf16.mxu0 %v1530_v15 }
  0x1f   :  { %186 = vmatpush1.bf16.msra.mxu0 %v1532_v16 }
  0x22   :  { %204 = vmatmul.mubr.bf16.vlgmr.msra.gmra.mrb[0].mxu0 %v67_v19  ;;  %v1854_v19 = vld [vmem:[%s2355_s0 + $0x8] sm:$0xff]  }
  0x23   :  { %213 = vmatprep.mubr.bf16.mxu0 %v1654_v1 }
  0x2a   :  { %214 = vmatmul.mubr.bf16.gmra.mrb[4].mxu0 %v68_v22  ;;  %v1871_v22 = vld [vmem:[%s2355_s0 + $0x20] sm:$0xff]  }
  0x2b   :  { %223 = vmatprep.mubr.bf16.mxu0 %v1654_v1 }
  0x32   :  { %224 = vmatmul.mubr.bf16.gmra.mrb[8].mxu0 %v69_v25  ;;  %v1890_v25 = vld [vmem:[%s2355_s0 + $0x38] sm:$0xff]  }
  0x33   :  { %233 = vmatprep.mubr.bf16.mxu0 %v1654_v1 }
  0x3a   :  { %234 = vmatmul.mubr.bf16.gmra.mrb[12].mxu0 %v70_v28  ;;  %v1546_v28 = vld [vmem:[%s2353_s2 + $0x94] ss:$8 sps:$4 sm:$0xff]  }
  0x3b   :  { %243 = vmatprep.mubr.bf16.mxu0 %v1654_v1 }
  0x42   :  { %244 = vmatmul.mubr.bf16.gmra.mrb[16].mxu0 %v71_v31  ;;  %v1547_v31 = vld [vmem:[%s2353_s2 + $0xa0] ss:$8 sps:$4 sm:$0xff]  }
  0x43   :  { %253 = vmatprep.mubr.bf16.mxu0 %v1654_v1 }
  0x4a   :  { %254 = vmatmul.mubr.bf16.gmra.mrb[20].mxu0 %v72_v34 }
  0x4b   :  { %263 = vmatprep.mubr.bf16.mxu0 %v1654_v1 }
  0x52   :  { %264 = vmatmul.mubr.bf16.gmra.mrb[24].mxu0 %v73_v37 }
  0x53   :  { %273 = vmatprep.mubr.bf16.mxu0 %v1654_v1 }
  0x5a   :  { %274 = vmatmul.mubr.bf16.gmra.mrb[28].mxu0 %v74_v40 }
  0x5b   :  { %1450 = vmatprep.mubr.bf16.mxu0 %v1533_v41 }
  0xf5   :  { %v205_v42 = vpop.f32.mrb[0].mxu0 }
  0xf6   :  { %v1819_v43 = vpop.f32.mrb[1].mxu0 }
  0xf7   :  { %v209_v44 = vpop.f32.mrb[2].mxu0 }
  0xf8   :  { %v284_v45 = vpack.c.bf16 %v209_v44, %v205_v42  ;;  %v1821_v46 = vpop.f32.mrb[3].mxu0 }
  0xfa   :  { %1402 = vmatprep.subr.bf16.mxu1 %v284_v45 }
  0xfb   :  { %1403 = vmatpush3.bf16.msra.mxu1 %v284_v45 }
  0xfd   :  { %v215_v47 = vpop.f32.mrb[4].mxu0 }
  0xfe   :  { %v1823_v48 = vpop.f32.mrb[5].mxu0 }
  0xff   :  { %v219_v49 = vpop.f32.mrb[6].mxu0 }
 0x100   :  { %v285_v50 = vpack.c.bf16 %v219_v49, %v215_v47  ;;  %v1825_v51 = vpop.f32.mrb[7].mxu0 }
 0x102   :  { %1404 = vmatprep.subr.bf16.mxu1 %v285_v50 }
 0x103   :  { %1405 = vmatpush3.bf16.msra.mxu1 %v285_v50 }
 0x105   :  { %v225_v52 = vpop.f32.mrb[8].mxu0 }
 0x106   :  { %v1827_v53 = vpop.f32.mrb[9].mxu0 }
 0x107   :  { %v229_v54 = vpop.f32.mrb[10].mxu0 }
 0x108   :  { %v286_v55 = vpack.c.bf16 %v229_v54, %v225_v52  ;;  %v1829_v56 = vpop.f32.mrb[11].mxu0 }
 0x10a   :  { %1406 = vmatprep.subr.bf16.mxu1 %v286_v55 }
 0x10b   :  { %1407 = vmatpush3.bf16.msra.mxu1 %v286_v55 }
 0x10d   :  { %v235_v57 = vpop.f32.mrb[12].mxu0 }
 0x10e   :  { %v1831_v58 = vpop.f32.mrb[13].mxu0 }
 0x10f   :  { %v239_v59 = vpop.f32.mrb[14].mxu0 }
 0x110   :  { %v287_v60 = vpack.c.bf16 %v239_v59, %v235_v57  ;;  %v1833_v61 = vpop.f32.mrb[15].mxu0 }
 0x112   :  { %1408 = vmatprep.subr.bf16.mxu1 %v287_v60 }
 0x113   :  { %1409 = vmatpush3.bf16.msra.mxu1 %v287_v60 }
 0x115   :  { %v245_v62 = vpop.f32.mrb[16].mxu0 }
 0x116   :  { %v1835_v63 = vpop.f32.mrb[17].mxu0 }
 0x117   :  { %v249_v0 = vpop.f32.mrb[18].mxu0 }
 0x118   :  { %v288_v2 = vpack.c.bf16 %v249_v0, %v245_v62  ;;  %v1837_v3 = vpop.f32.mrb[19].mxu0 }
 0x11a   :  { %1410 = vmatprep.subr.bf16.mxu1 %v288_v2 }
 0x11b   :  { %1411 = vmatpush3.bf16.msra.mxu1 %v288_v2 }
 0x11d   :  { %v255_v4 = vpop.f32.mrb[20].mxu0 }
 0x11e   :  { %v1839_v5 = vpop.f32.mrb[21].mxu0 }
 0x11f   :  { %v259_v6 = vpop.f32.mrb[22].mxu0 }
 0x120   :  { %v289_v7 = vpack.c.bf16 %v259_v6, %v255_v4  ;;  %v1841_v8 = vpop.f32.mrb[23].mxu0 }
 0x122   :  { %1412 = vmatprep.subr.bf16.mxu1 %v289_v7 }
 0x123   :  { %1413 = vmatpush3.bf16.msra.mxu1 %v289_v7 }
 0x125   :  { %v265_v9 = vpop.f32.mrb[24].mxu0 }
 0x126   :  { %v1843_v10 = vpop.f32.mrb[25].mxu0 }
 0x127   :  { %v269_v11 = vpop.f32.mrb[26].mxu0 }
 0x128   :  { %v290_v12 = vpack.c.bf16 %v269_v11, %v265_v9  ;;  %v1845_v13 = vpop.f32.mrb[27].mxu0 }
 0x12a   :  { %1414 = vmatprep.subr.bf16.mxu1 %v290_v12 }
 0x12b   :  { %1415 = vmatpush3.bf16.msra.mxu1 %v290_v12 }
 0x12d   :  { %v275_v14 = vpop.f32.mrb[28].mxu0 }
 0x12e   :  { %v1847_v15 = vpop.f32.mrb[29].mxu0 }
 0x12f   :  { %v279_v16 = vpop.f32.mrb[30].mxu0 }
 0x130   :  { %v291_v17 = vpack.c.bf16 %v279_v16, %v275_v14  ;;  %v1849_v18 = vpop.f32.mrb[31].mxu0 }
 0x132   :  { %1416 = vmatprep.subr.bf16.mxu1 %v291_v17 }
 0x133   :  { %1417 = vmatpush3.bf16.msra.mxu1 %v291_v17 }
 0x134   :  { %661 = vmatprep.subr.bf16.mxu1 %v1543_v27 }
 0x136   :  { %1419 = vmatmul.mubr.bf16.vlgmr.msra.gmra.mrb[0].mxu1 %v1854_v19 }
 0x137   :  { %1422 = vmatprep.mubr.bf16.mxu1 %v1859_v20  ;;  %662 = vmatpush1.bf16.msra.mxu1 %v1541_v26 }
 0x138   :  { %663 = vmatprep.subr.bf16.mxu1 %v1546_v28 }
 0x13b   :  { %664 = vmatpush1.bf16.msra.mxu1 %v1544_v29 }
 0x13c   :  { %665 = vmatprep.subr.bf16.mxu1 %v1549_v30 }
 0x13e   :  { %1423 = vmatmul.mubr.bf16.gmra.mrb[4].mxu1 %v1866_v21 }
 0x13f   :  { %1426 = vmatprep.mubr.bf16.mxu1 %v1871_v22  ;;  %666 = vmatpush1.bf16.msra.mxu1 %v1547_v31 }
 0x146   :  { %1427 = vmatmul.mubr.bf16.gmra.mrb[8].mxu1 %v1878_v23 }
 0x147   :  { %1430 = vmatprep.mubr.bf16.mxu1 %v1883_v24 }
 0x14e   :  { %1431 = vmatmul.mubr.bf16.gmra.mrb[12].mxu1 %v1890_v25 }
 0x14f   :  { %693 = vmatprep.mubr.bf16.mxu1 %v1654_v1 }
 0x209   :  { %v1420_v32 = vpop.f32.mrb[0].mxu1 }
 0x20a   :  { %v383_v34 = vadd.f32 %v1420_v32, %v1823_v48  ;;  %v374_v35 = vpop.f32.mrb[1].mxu1  ;;  %v1555_v32 = vld [vmem:[%s2353_s2 + $0xc4] ss:$8 sps:$4 sm:$0xff]  }
 0x20b   :  { %v375_v36 = vadd.f32 %v374_v35, %v1819_v43  ;;  %v1421_v37 = vpop.f32.mrb[2].mxu1 }
 0x20c   :  { %v386_v38 = vadd.f32 %v1421_v37, %v1825_v51  ;;  %v377_v39 = vpop.f32.mrb[3].mxu1  ;;  %v1921_v40 = vadd.f32 %v1915_v33, %v383_v34  ;;  %v1553_v37 = vld [vmem:[%s2353_s2 + $0xc0] ss:$8 sps:$4 sm:$0xff]  }
 0x20d   :  { %v378_v41 = vadd.f32 %v377_v39, %v1821_v46  ;;  %v1925_v42 = vadd.f32 %v1915_v33, %v375_v36 }
 0x20e   :  { %v1928_v44 = vadd.f32 %v1915_v33, %v386_v38  ;;  %v462_v45 = vmul.f32 %v1921_v40, %v1921_v40 }
 0x20f   :  { %v1933_v43 = vadd.f32 %v1915_v33, %v378_v41  ;;  %v460_v47 = vmul.f32 %v1925_v42, %v1925_v42 }
 0x210   :  { %480 = vadd.xlane.f32.xlu1 %v462_v45  ;;  %v463_v50 = vmul.f32 %v1928_v44, %v1928_v44  ;;  %v1558_v45 = vld [vmem:[%s2353_s2 + $0xd4] ss:$8 sps:$4 sm:$0xff]  }
 0x211   :  { %v1424_v48 = vpop.f32.mrb[4].mxu1  ;;  %476 = vadd.xlane.f32.xlu0 %v460_v47  ;;  %v461_v54 = vmul.f32 %v1933_v43, %v1933_v43 }
 0x212   :  { %v399_v46 = vadd.f32 %v1424_v48, %v1831_v58  ;;  %v390_v49 = vpop.f32.mrb[5].mxu1 }
 0x213   :  { %v391_v51 = vadd.f32 %v390_v49, %v1827_v53  ;;  %v1425_v52 = vpop.f32.mrb[6].mxu1 }
 0x214   :  { %v402_v55 = vadd.f32 %v1425_v52, %v1833_v61  ;;  %482 = vadd.xlane.f32.xlu1 %v463_v50  ;;  %v393_v57 = vpop.f32.mrb[7].mxu1  ;;  %v1949_v58 = vadd.f32 %v1915_v33, %v399_v46  ;;  %v1561_v50 = vld [vmem:[%s2353_s2 + $0xe4] ss:$8 sps:$4 sm:$0xff]   ;;  %v1559_v52 = vld [vmem:[%s2353_s2 + $0xe0] ss:$8 sps:$4 sm:$0xff]  }
 0x215   :  { %v1945_v59 = vadd.f32 %v1915_v33, %v391_v51  ;;  %v394_v60 = vadd.f32 %v393_v57, %v1829_v56  ;;  %478 = vadd.xlane.f32.xlu0 %v461_v54  ;;  %v1564_v54 = vld [vmem:[%s2353_s2 + $0xf4] ss:$8 sps:$4 sm:$0xff]  }
 0x216   :  { %v1957_v0 = vadd.f32 %v1915_v33, %v402_v55  ;;  %v466_v9 = vmul.f32 %v1949_v58, %v1949_v58  ;;  %v1562_v55 = vld [vmem:[%s2353_s2 + $0xf0] ss:$8 sps:$4 sm:$0xff]  }
 0x217   :  { %v1952_v62 = vadd.f32 %v1915_v33, %v394_v60  ;;  %v464_v53 = vmul.f32 %v1945_v59, %v1945_v59 }
 0x219   :  { %v1428_v61 = vpop.f32.mrb[8].mxu1  ;;  %484 = vadd.xlane.f32.xlu0 %v464_v53  ;;  %v465_v2 = vmul.f32 %v1952_v62, %v1952_v62 }
 0x21a   :  { %v415_v56 = vadd.f32 %v1428_v61, %v1839_v5  ;;  %v406_v4 = vpop.f32.mrb[9].mxu1  ;;  %v467_v5 = vmul.f32 %v1957_v0, %v1957_v0 }
 0x21b   :  { %v407_v6 = vadd.f32 %v406_v4, %v1835_v63  ;;  %v1429_v7 = vpop.f32.mrb[10].mxu1  ;;  %486 = vadd.xlane.f32.xlu1 %v465_v2  ;;  %v1552_v63 = vld [vmem:[%s2353_s2 + $0xb4] ss:$8 sps:$4 sm:$0xff]  }
 0x21c   :  { %v418_v11 = vadd.f32 %v1429_v7, %v1841_v8  ;;  %v409_v12 = vpop.f32.mrb[11].mxu1  ;;  %v1976_v17 = vadd.f32 %v1915_v33, %v415_v56  ;;  %667 = vmatprep.subr.bf16.mxu1 %v1552_v63 }
 0x21d   :  { %v1967_v14 = vadd.f32 %v1915_v33, %v407_v6  ;;  %v410_v16 = vadd.f32 %v409_v12, %v1837_v3  ;;  %488 = vadd.xlane.f32.xlu0 %v466_v9  ;;  %v1550_v3 = vld [vmem:[%s2353_s2 + $0xb0] ss:$8 sps:$4 sm:$0xff]  }
 0x21e   :  { %v1987_v27 = vadd.f32 %v1915_v33, %v418_v11  ;;  %668 = vmatpush1.bf16.msra.mxu1 %v1550_v3  ;;  %v470_v36 = vmul.f32 %v1976_v17, %v1976_v17 }
 0x21f   :  { %v1979_v26 = vadd.f32 %v1915_v33, %v410_v16  ;;  %490 = vadd.xlane.f32.xlu1 %v467_v5  ;;  %v468_v8 = vmul.f32 %v1967_v14, %v1967_v14  ;;  %669 = vmatprep.subr.bf16.mxu1 %v1555_v32 }
 0x221   :  { %v1432_v28 = vpop.f32.mrb[12].mxu1  ;;  %492 = vadd.xlane.f32.xlu0 %v468_v8  ;;  %v469_v29 = vmul.f32 %v1979_v26, %v1979_v26 }
 0x222   :  { %v431_v30 = vadd.f32 %v1432_v28, %v1847_v15  ;;  %v422_v31 = vpop.f32.mrb[13].mxu1  ;;  %670 = vmatpush1.bf16.msra.mxu1 %v1553_v37 }
 0x223   :  { %v423_v34 = vadd.f32 %v422_v31, %v1843_v10  ;;  %v1433_v35 = vpop.f32.mrb[14].mxu1  ;;  %494 = vadd.xlane.f32.xlu1 %v469_v29  ;;  %v471_v10 = vmul.f32 %v1987_v27, %v1987_v27  ;;  %671 = vmatprep.subr.bf16.mxu1 %v1558_v45 }
 0x224   :  { %v434_v38 = vadd.f32 %v1433_v35, %v1849_v18  ;;  %v425_v39 = vpop.f32.mrb[15].mxu1  ;;  %v2012_v47 = vadd.f32 %v1915_v33, %v431_v30 }
 0x225   :  { %v2003_v15 = vadd.f32 %v1915_v33, %v423_v34  ;;  %v426_v41 = vadd.f32 %v425_v39, %v1845_v13  ;;  %496 = vadd.xlane.f32.xlu0 %v470_v36  ;;  %v1556_v13 = vld [vmem:[%s2353_s2 + $0xd0] ss:$8 sps:$4 sm:$0xff]  }
 0x226   :  { %v2023_v46 = vadd.f32 %v1915_v33, %v434_v38  ;;  %672 = vmatpush1.bf16.msra.mxu1 %v1556_v13  ;;  %v474_v51 = vmul.f32 %v2012_v47, %v2012_v47 }
 0x227   :  { %v2015_v18 = vadd.f32 %v1915_v33, %v426_v41  ;;  %498 = vadd.xlane.f32.xlu1 %v471_v10  ;;  %v472_v48 = vmul.f32 %v2003_v15, %v2003_v15  ;;  %673 = vmatprep.subr.bf16.mxu1 %v1561_v50 }
 0x228   :  { %v475_v33 = vmul.f32 %v2023_v46, %v2023_v46 }
 0x229   :  { %500 = vadd.xlane.f32.xlu0 %v472_v48  ;;  %v473_v49 = vmul.f32 %v2015_v18, %v2015_v18 }
 0x22a   :  { %674 = vmatpush1.bf16.msra.mxu1 %v1559_v52 }
 0x22b   :  { %502 = vadd.xlane.f32.xlu1 %v473_v49  ;;  %675 = vmatprep.subr.bf16.mxu1 %v1564_v54 }
 0x22d   :  { %504 = vadd.xlane.f32.xlu0 %v474_v51 }
 0x22e   :  { %676 = vmatpush1.bf16.msra.mxu1 %v1562_v55 }
 0x22f   :  { %506 = vadd.xlane.f32.xlu1 %v475_v33 }
 0x29d   :  { %v481_v57 = vpop.xlane.xlu1 %480 }
 0x29e   :  { %v477_v60 = vpop.xlane.xlu0 %476  ;;  %v510_v6 = vmax.f32 %v481_v57, 1e-24 }
 0x29f   :  { %v508_v53 = vmax.f32 %v477_v60, 1e-24 }
 0x2a1   :  { %v483_v61 = vpop.xlane.xlu1 %482  ;;  %1582 = vrsqrt.f32 %v508_v53 }
 0x2a2   :  { %v479_v2 = vpop.xlane.xlu0 %478  ;;  %v511_v4 = vmax.f32 %v483_v61, 1e-24 }
 0x2a3   :  { %v509_v56 = vmax.f32 %v479_v2, 1e-24 }
 0x2a5   :  { %1584 = vrsqrt.f32 %v509_v56 }
 0x2a6   :  { %1586 = vrsqrt.f32 %v511_v4  ;;  %v485_v9 = vpop.xlane.xlu0 %484 }
 0x2a7   :  { %1588 = vrsqrt.f32 %v510_v6  ;;  %v512_v5 = vmax.f32 %v485_v9, 1e-24 }
 0x2a8   :  { %v487_v7 = vpop.xlane.xlu1 %486 }
 0x2a9   :  { %v513_v12 = vmax.f32 %v487_v7, 1e-24 }
 0x2aa   :  { %v489_v30 = vpop.xlane.xlu0 %488 }
 0x2ab   :  { %v1583_v11 = vpop.eup %1582  ;;  %1590 = vrsqrt.f32 %v513_v12  ;;  %v514_v35 = vmax.f32 %v489_v30, 1e-24 }
 0x2ac   :  { %v540_v63 = vmul.f32 %v1583_v11, %v1925_v42  ;;  %v491_v3 = vpop.xlane.xlu1 %490  ;;  %1592 = vrsqrt.f32 %v512_v5 }
 0x2ad   :  { %v515_v32 = vmax.f32 %v491_v3, 1e-24 }
 0x2ae   :  { %v493_v38 = vpop.xlane.xlu0 %492 }
 0x2af   :  { %v1585_v16 = vpop.eup %1584  ;;  %1594 = vrsqrt.f32 %v515_v32  ;;  %v516_v45 = vmax.f32 %v493_v38, 1e-24 }
 0x2b0   :  { %v541_v8 = vmul.f32 %v1585_v16, %v1933_v43  ;;  %v1587_v29 = vpop.eup %1586  ;;  %v495_v42 = vpop.xlane.xlu1 %494  ;;  %1596 = vrsqrt.f32 %v514_v35 }
 0x2b1   :  { %v1589_v31 = vpop.eup %1588  ;;  %v543_v34 = vmul.f32 %v1587_v29, %v1928_v44  ;;  %v517_v41 = vmax.f32 %v495_v42, 1e-24 }
 0x2b2   :  { %v556_v28 = vpack.c.bf16 %v541_v8, %v540_v63  ;;  %v542_v36 = vmul.f32 %v1589_v31, %v1921_v40  ;;  %v497_v49 = vpop.xlane.xlu0 %496  ;;  %v1655_v31 = vmov 0.0  }
 0x2b3   :  { %1598 = vrsqrt.f32 %v517_v41  ;;  %v518_v33 = vmax.f32 %v497_v49, 1e-24  ;;  %1486 = vmatprep.subr.bf16.mxu1 %v1655_v31 }
 0x2b4   :  { %694 = vmatmul.mubr.bf16.vlgmr.msra.gmra.mrb[16].mxu1 %v556_v28  ;;  %v557_v37 = vpack.c.bf16 %v543_v34, %v542_v36  ;;  %v499_v44 = vpop.xlane.xlu1 %498  ;;  %1600 = vrsqrt.f32 %v516_v45 }
 0x2b5   :  { %703 = vmatprep.mubr.bf16.mxu1 %v1654_v1  ;;  %v1591_v43 = vpop.eup %1590  ;;  %v519_v51 = vmax.f32 %v499_v44, 1e-24 }
 0x2b6   :  { %v1593_v39 = vpop.eup %1592  ;;  %v545_v10 = vmul.f32 %v1591_v43, %v1952_v62  ;;  %v501_v57 = vpop.xlane.xlu0 %500 }
 0x2b7   :  { %v544_v48 = vmul.f32 %v1593_v39, %v1945_v59  ;;  %1602 = vrsqrt.f32 %v519_v51  ;;  %v520_v2 = vmax.f32 %v501_v57, 1e-24 }
 0x2b8   :  { %v503_v62 = vpop.xlane.xlu1 %502  ;;  %1604 = vrsqrt.f32 %v518_v33 }
 0x2b9   :  { %v558_v13 = vpack.c.bf16 %v545_v10, %v544_v48  ;;  %v1595_v40 = vpop.eup %1594  ;;  %v521_v53 = vmax.f32 %v503_v62, 1e-24 }
 0x2ba   :  { %v1597_v50 = vpop.eup %1596  ;;  %v547_v52 = vmul.f32 %v1595_v40, %v1957_v0  ;;  %v505_v6 = vpop.xlane.xlu0 %504 }
 0x2bb   :  { %v546_v54 = vmul.f32 %v1597_v50, %v1949_v58  ;;  %1606 = vrsqrt.f32 %v521_v53  ;;  %v522_v12 = vmax.f32 %v505_v6, 1e-24 }
 0x2bc   :  { %704 = vmatmul.mubr.bf16.gmra.mrb[20].mxu1 %v557_v37  ;;  %v507_v0 = vpop.xlane.xlu1 %506  ;;  %1608 = vrsqrt.f32 %v520_v2 }
 0x2bd   :  { %713 = vmatprep.mubr.bf16.mxu1 %v1654_v1  ;;  %v559_v55 = vpack.c.bf16 %v547_v52, %v546_v54  ;;  %v1599_v59 = vpop.eup %1598  ;;  %v523_v9 = vmax.f32 %v507_v0, 1e-24 }
 0x2be   :  { %v1601_v60 = vpop.eup %1600  ;;  %v549_v61 = vmul.f32 %v1599_v59, %v1979_v26 }
 0x2bf   :  { %v548_v56 = vmul.f32 %v1601_v60, %v1967_v14  ;;  %1610 = vrsqrt.f32 %v523_v9 }
 0x2c0   :  { %1612 = vrsqrt.f32 %v522_v12  ;;  %v1565_v12 = vld [vmem:[%s2357_s5] sm:$0xff]  }
 0x2c1   :  { %v560_v4 = vpack.c.bf16 %v549_v61, %v548_v56  ;;  %v1603_v58 = vpop.eup %1602 }
 0x2c2   :  { %v1605_v7 = vpop.eup %1604  ;;  %v551_v11 = vmul.f32 %v1603_v58, %v1987_v27 }
 0x2c3   :  { %v550_v16 = vmul.f32 %v1605_v7, %v1976_v17 }
 0x2c4   :  { %714 = vmatmul.mubr.bf16.gmra.mrb[24].mxu1 %v558_v13 }
 0x2c5   :  { %723 = vmatprep.mubr.bf16.mxu1 %v1654_v1  ;;  %v561_v26 = vpack.c.bf16 %v551_v11, %v550_v16  ;;  %v1607_v5 = vpop.eup %1606  ;;  %v1566_v16 = vld [vmem:[%s2357_s5 + $0x8] sm:$0xff]  }
 0x2c6   :  { %v1609_v14 = vpop.eup %1608  ;;  %v553_v63 = vmul.f32 %v1607_v5, %v2015_v18  ;;  %v1578_v5 = vld [vmem:[%s2359_s7 + $0x20] sm:$0xff]  }
 0x2c7   :  { %v552_v8 = vmul.f32 %v1609_v14, %v2003_v15  ;;  %v1574_v15 = vld [vmem:[%s2359_s7] sm:$0xff]   ;;  %v1579_v14 = vld [vmem:[%s2359_s7 + $0x28] sm:$0xff]  }
 0x2c8   :  { %1487 = vmatpush3.bf16.msra.mxu1 %v1574_v15 }
 0x2c9   :  { %v562_v3 = vpack.c.bf16 %v553_v63, %v552_v8  ;;  %v1611_v28 = vpop.eup %1610  ;;  %1488 = vmatprep.subr.bf16.mxu1 %v1655_v31  ;;  %v1580_v63 = vld [vmem:[%s2359_s7 + $0x30] sm:$0xff]   ;;  %v1581_v8 = vld [vmem:[%s2359_s7 + $0x38] sm:$0xff]  }
 0x2ca   :  { %v1613_v29 = vpop.eup %1612  ;;  %v555_v17 = vmul.f32 %v1611_v28, %v2023_v46  ;;  %v2179_v28 = vld [vmem:[%s2356_s3 + $0x1] ss:$0 sm:$0xff] }
 0x2cb   :  { %v554_v27 = vmul.f32 %v1613_v29, %v2012_v47  ;;  %v1576_v47 = vld [vmem:[%s2359_s7 + $0x10] sm:$0xff]  }
 0x2cc   :  { %724 = vmatmul.mubr.bf16.gmra.mrb[28].mxu1 %v559_v55 }
 0x2cd   :  { %733 = vmatprep.mubr.bf16.mxu1 %v1654_v1  ;;  %v563_v30 = vpack.c.bf16 %v555_v17, %v554_v27 }
 0x2d4   :  { %734 = vmatmul.mubr.bf16.gmra.mrb[32].mxu1 %v560_v4 }
 0x2d5   :  { %743 = vmatprep.mubr.bf16.mxu1 %v1654_v1 }
 0x2dc   :  { %744 = vmatmul.mubr.bf16.gmra.mrb[36].mxu1 %v561_v26  ;;  %v1567_v26 = vld [vmem:[%s2357_s5 + $0x10] sm:$0xff]  }
 0x2dd   :  { %753 = vmatprep.mubr.bf16.mxu1 %v1654_v1 }
 0x2e4   :  { %754 = vmatmul.mubr.bf16.gmra.mrb[40].mxu1 %v562_v3 }
 0x2e5   :  { %763 = vmatprep.mubr.bf16.mxu1 %v1654_v1  ;;  %v1575_v1 = vld [vmem:[%s2359_s7 + $0x8] sm:$0xff]  }
 0x2e6   :  { %1489 = vmatpush3.bf16.msra.mxu1 %v1575_v1 }
 0x2e7   :  { %1490 = vmatprep.subr.bf16.mxu1 %v1655_v31 }
 0x2ea   :  { %1491 = vmatpush3.bf16.msra.mxu1 %v1576_v47 }
 0x2eb   :  { %1492 = vmatprep.subr.bf16.mxu1 %v1655_v31 }
 0x2ec   :  { %764 = vmatmul.mubr.bf16.gmra.mrb[44].mxu1 %v563_v30 }
 0x2ed   :  { %1502 = vmatprep.mubr.msk.bf16.mxu1 %vm1656_vm0, %v1655_v31 }
 0x387   :  { %v695_v18 = vpop.f32.mrb[16].mxu1 }
 0x388   :  { %v2081_v46 = vpop.f32.mrb[17].mxu1 }
 0x389   :  { %v699_v32 = vpop.f32.mrb[18].mxu1 }
 0x38a   :  { %v774_v34 = vpack.c.bf16 %v699_v32, %v695_v18  ;;  %v2083_v35 = vpop.f32.mrb[19].mxu1 }
 0x38c   :  { %1434 = vmatprep.subr.bf16.mxu0 %v774_v34 }
 0x38d   :  { %1435 = vmatpush3.bf16.msra.mxu0 %v774_v34 }
 0x38f   :  { %v705_v36 = vpop.f32.mrb[20].mxu1 }
 0x390   :  { %v2085_v42 = vpop.f32.mrb[21].mxu1 }
 0x391   :  { %v709_v37 = vpop.f32.mrb[22].mxu1 }
 0x392   :  { %v775_v43 = vpack.c.bf16 %v709_v37, %v705_v36  ;;  %v2087_v38 = vpop.f32.mrb[23].mxu1 }
 0x394   :  { %1436 = vmatprep.subr.bf16.mxu0 %v775_v43 }
 0x395   :  { %1437 = vmatpush3.bf16.msra.mxu0 %v775_v43 }
 0x397   :  { %v715_v39 = vpop.f32.mrb[24].mxu1 }
 0x398   :  { %v2089_v41 = vpop.f32.mrb[25].mxu1 }
 0x399   :  { %v719_v10 = vpop.f32.mrb[26].mxu1 }
 0x39a   :  { %v776_v45 = vpack.c.bf16 %v719_v10, %v715_v39  ;;  %v2091_v48 = vpop.f32.mrb[27].mxu1 }
 0x39c   :  { %1438 = vmatprep.subr.bf16.mxu0 %v776_v45 }
 0x39d   :  { %1439 = vmatpush3.bf16.msra.mxu0 %v776_v45 }
 0x39f   :  { %v725_v44 = vpop.f32.mrb[28].mxu1 }
 0x3a0   :  { %v2093_v13 = vpop.f32.mrb[29].mxu1 }
 0x3a1   :  { %v729_v40 = vpop.f32.mrb[30].mxu1 }
 0x3a2   :  { %v777_v49 = vpack.c.bf16 %v729_v40, %v725_v44  ;;  %v2095_v50 = vpop.f32.mrb[31].mxu1 }
 0x3a4   :  { %1440 = vmatprep.subr.bf16.mxu0 %v777_v49 }
 0x3a5   :  { %1441 = vmatpush3.bf16.msra.mxu0 %v777_v49 }
 0x3a7   :  { %v735_v51 = vpop.f32.mrb[32].mxu1 }
 0x3a8   :  { %v2097_v52 = vpop.f32.mrb[33].mxu1 }
 0x3a9   :  { %v739_v33 = vpop.f32.mrb[34].mxu1 }
 0x3aa   :  { %v778_v54 = vpack.c.bf16 %v739_v33, %v735_v51  ;;  %v2099_v62 = vpop.f32.mrb[35].mxu1 }
 0x3ac   :  { %1442 = vmatprep.subr.bf16.mxu0 %v778_v54 }
 0x3ad   :  { %1443 = vmatpush3.bf16.msra.mxu0 %v778_v54 }
 0x3af   :  { %v745_v55 = vpop.f32.mrb[36].mxu1 }
 0x3b0   :  { %v2101_v59 = vpop.f32.mrb[37].mxu1 }
 0x3b1   :  { %v749_v57 = vpop.f32.mrb[38].mxu1 }
 0x3b2   :  { %v779_v60 = vpack.c.bf16 %v749_v57, %v745_v55  ;;  %v2103_v53 = vpop.f32.mrb[39].mxu1 }
 0x3b4   :  { %1444 = vmatprep.subr.bf16.mxu0 %v779_v60 }
 0x3b5   :  { %1445 = vmatpush3.bf16.msra.mxu0 %v779_v60 }
 0x3b7   :  { %v755_v61 = vpop.f32.mrb[40].mxu1 }
 0x3b8   :  { %v2105_v2 = vpop.f32.mrb[41].mxu1 }
 0x3b9   :  { %v759_v56 = vpop.f32.mrb[42].mxu1 }
 0x3ba   :  { %v780_v0 = vpack.c.bf16 %v759_v56, %v755_v61  ;;  %v2107_v4 = vpop.f32.mrb[43].mxu1 }
 0x3bc   :  { %1446 = vmatprep.subr.bf16.mxu0 %v780_v0 }
 0x3bd   :  { %1447 = vmatpush3.bf16.msra.mxu0 %v780_v0 }
 0x3bf   :  { %v765_v58 = vpop.f32.mrb[44].mxu1 }
 0x3c0   :  { %v2109_v6 = vpop.f32.mrb[45].mxu1 }
 0x3c1   :  { %v769_v7 = vpop.f32.mrb[46].mxu1 }
 0x3c2   :  { %v781_v9 = vpack.c.bf16 %v769_v7, %v765_v58  ;;  %v2111_v11 = vpop.f32.mrb[47].mxu1 }
 0x3c4   :  { %1448 = vmatprep.subr.bf16.mxu0 %v781_v9 }
 0x3c5   :  { %1449 = vmatpush3.bf16.msra.mxu0 %v781_v9 }
 0x3c6   :  { %1466 = vmatprep.subr.bf16.mxu0 %v1655_v31 }
 0x3c8   :  { %1451 = vmatmul.mubr.bf16.vlgmr.msra.gmra.mrb[32].mxu0 %v1854_v19  ;;  %v1568_v19 = vld [vmem:[%s2357_s5 + $0x18] sm:$0xff]  }
 0x3c9   :  { %1467 = vmatpush3.bf16.msra.mxu0 %v1565_v12  ;;  %1454 = vmatprep.mubr.bf16.mxu0 %v1859_v20  ;;  %v1569_v20 = vld [vmem:[%s2357_s5 + $0x20] sm:$0xff]  }
 0x3ca   :  { %1468 = vmatprep.subr.bf16.mxu0 %v1655_v31 }
 0x3cd   :  { %1469 = vmatpush3.bf16.msra.mxu0 %v1566_v16 }
 0x3ce   :  { %1470 = vmatprep.subr.bf16.mxu0 %v1655_v31 }
 0x3d0   :  { %1455 = vmatmul.mubr.bf16.gmra.mrb[36].mxu0 %v1866_v21  ;;  %v1570_v21 = vld [vmem:[%s2357_s5 + $0x28] sm:$0xff]  }
 0x3d1   :  { %1471 = vmatpush3.bf16.msra.mxu0 %v1567_v26  ;;  %1458 = vmatprep.mubr.bf16.mxu0 %v1871_v22  ;;  %v1571_v22 = vld [vmem:[%s2357_s5 + $0x30] sm:$0xff]  }
 0x3d2   :  { %1472 = vmatprep.subr.bf16.mxu0 %v1655_v31 }
 0x3d5   :  { %1473 = vmatpush3.bf16.msra.mxu0 %v1568_v19 }
 0x3d6   :  { %1474 = vmatprep.subr.bf16.mxu0 %v1655_v31 }
 0x3d8   :  { %1459 = vmatmul.mubr.bf16.gmra.mrb[40].mxu0 %v1878_v23  ;;  %v1572_v23 = vld [vmem:[%s2357_s5 + $0x38] sm:$0xff]  }
 0x3d9   :  { %1475 = vmatpush3.bf16.msra.mxu0 %v1569_v20  ;;  %1462 = vmatprep.mubr.bf16.mxu0 %v1883_v24  ;;  %v1573_v24 = vld [vmem:[%s2358_s4] sm:$0xff]  }
 0x3da   :  { %1476 = vmatprep.subr.bf16.mxu0 %v1655_v31 }
 0x3dd   :  { %1477 = vmatpush3.bf16.msra.mxu0 %v1570_v21 }
 0x3de   :  { %1478 = vmatprep.subr.bf16.mxu0 %v1655_v31 }
 0x3e0   :  { %1463 = vmatmul.mubr.bf16.gmra.mrb[44].mxu0 %v1890_v25  ;;  %v1577_v25 = vld [vmem:[%s2359_s7 + $0x18] sm:$0xff]  }
 0x3e1   :  { %1479 = vmatpush3.bf16.msra.mxu0 %v1571_v22  ;;  %1482 = vmatprep.mubr.msk.bf16.mxu0 %vm1656_vm0, %v1655_v31 }
 0x3e2   :  { %1480 = vmatprep.subr.bf16.mxu0 %v1655_v31  ;;  %1493 = vmatpush3.bf16.msra.mxu1 %v1577_v25 }
 0x3e3   :  { %1494 = vmatprep.subr.bf16.mxu1 %v1655_v31 }
 0x3e5   :  { %1481 = vmatpush3.bf16.msra.mxu0 %v1572_v23 }
 0x3e6   :  { %1495 = vmatpush3.bf16.msra.mxu1 %v1578_v5 }
 0x3e7   :  { %1496 = vmatprep.subr.bf16.mxu1 %v1655_v31 }
 0x3e8   :  { %1483 = vmatmul.mubr.bf16.vlgmr.msra.gmra.mrb[48].mxu0 %v1573_v24 }
 0x3ea   :  { %1497 = vmatpush3.bf16.msra.mxu1 %v1579_v14 }
 0x3eb   :  { %1498 = vmatprep.subr.bf16.mxu1 %v1655_v31 }
 0x3ee   :  { %1499 = vmatpush3.bf16.msra.mxu1 %v1580_v63 }
 0x3ef   :  { %1500 = vmatprep.subr.bf16.mxu1 %v1655_v31 }
 0x3f2   :  { %1501 = vmatpush3.bf16.msra.mxu1 %v1581_v8 }
 0x49b   :  { %v1452_v3 = vpop.f32.mrb[32].mxu0 }
 0x49c   :  { %v825_v29 = vadd.f32 %v1452_v3, %v2085_v42  ;;  %v816_v17 = vpop.f32.mrb[33].mxu0 }
 0x49d   :  { %v817_v27 = vadd.f32 %v816_v17, %v2081_v46  ;;  %v1453_v30 = vpop.f32.mrb[34].mxu0 }
 0x49e   :  { %v2184_v15 = vadd.f32 %v2179_v28, %v825_v29  ;;  %v828_v31 = vadd.f32 %v1453_v30, %v2087_v38  ;;  %v819_v1 = vpop.f32.mrb[35].mxu0 }
 0x49f   :  { %v820_v47 = vadd.f32 %v819_v1, %v2083_v35  ;;  %v2189_v18 = vadd.f32 %v2179_v28, %v817_v27 }
 0x4a0   :  { %v2192_v32 = vadd.f32 %v2179_v28, %v828_v31  ;;  %v905_v34 = vmul.f32 %v2184_v15, %v2184_v15 }
 0x4a1   :  { %v2197_v46 = vadd.f32 %v2179_v28, %v820_v47  ;;  %v903_v43 = vmul.f32 %v2189_v18, %v2189_v18 }
 0x4a2   :  { %923 = vadd.xlane.f32.xlu0 %v905_v34  ;;  %v906_v36 = vmul.f32 %v2192_v32, %v2192_v32 }
 0x4a3   :  { %v1456_v42 = vpop.f32.mrb[36].mxu0  ;;  %v904_v40 = vmul.f32 %v2197_v46, %v2197_v46 }
 0x4a4   :  { %v841_v37 = vadd.f32 %v1456_v42, %v2093_v13  ;;  %925 = vadd.xlane.f32.xlu1 %v906_v36  ;;  %v832_v35 = vpop.f32.mrb[37].mxu0 }
 0x4a5   :  { %v833_v38 = vadd.f32 %v832_v35, %v2089_v41  ;;  %v1457_v39 = vpop.f32.mrb[38].mxu0 }
 0x4a6   :  { %v2206_v10 = vadd.f32 %v2179_v28, %v841_v37  ;;  %v844_v45 = vadd.f32 %v1457_v39, %v2095_v50  ;;  %v835_v44 = vpop.f32.mrb[39].mxu0  ;;  %919 = vadd.xlane.f32.xlu0 %v903_v43 }
 0x4a7   :  { %v836_v13 = vadd.f32 %v835_v44, %v2091_v48  ;;  %v2213_v49 = vadd.f32 %v2179_v28, %v833_v38 }
 0x4a8   :  { %v2216_v51 = vadd.f32 %v2179_v28, %v844_v45  ;;  %921 = vadd.xlane.f32.xlu1 %v904_v40  ;;  %v909_v41 = vmul.f32 %v2206_v10, %v2206_v10 }
 0x4a9   :  { %v2221_v33 = vadd.f32 %v2179_v28, %v836_v13  ;;  %v907_v57 = vmul.f32 %v2213_v49, %v2213_v49 }
 0x4aa   :  { %931 = vadd.xlane.f32.xlu0 %v909_v41  ;;  %v910_v50 = vmul.f32 %v2216_v51, %v2216_v51 }
 0x4ab   :  { %v1460_v54 = vpop.f32.mrb[40].mxu0  ;;  %v908_v7 = vmul.f32 %v2221_v33, %v2221_v33 }
 0x4ac   :  { %v857_v48 = vadd.f32 %v1460_v54, %v2101_v59  ;;  %v848_v55 = vpop.f32.mrb[41].mxu0  ;;  %933 = vadd.xlane.f32.xlu1 %v910_v50 }
 0x4ad   :  { %v849_v60 = vadd.f32 %v848_v55, %v2097_v52  ;;  %v1461_v61 = vpop.f32.mrb[42].mxu0 }
 0x4ae   :  { %v2230_v56 = vadd.f32 %v2179_v28, %v857_v48  ;;  %v860_v0 = vadd.f32 %v1461_v61, %v2103_v53  ;;  %v851_v58 = vpop.f32.mrb[43].mxu0  ;;  %927 = vadd.xlane.f32.xlu0 %v907_v57 }
 0x4af   :  { %v852_v59 = vadd.f32 %v851_v58, %v2099_v62  ;;  %v2237_v9 = vadd.f32 %v2179_v28, %v849_v60 }
 0x4b0   :  { %v2240_v12 = vadd.f32 %v2179_v28, %v860_v0  ;;  %929 = vadd.xlane.f32.xlu1 %v908_v7  ;;  %v913_v52 = vmul.f32 %v2230_v56, %v2230_v56 }
 0x4b1   :  { %v2245_v16 = vadd.f32 %v2179_v28, %v852_v59  ;;  %v911_v20 = vmul.f32 %v2237_v9, %v2237_v9 }
 0x4b2   :  { %939 = vadd.xlane.f32.xlu0 %v913_v52  ;;  %v914_v53 = vmul.f32 %v2240_v12, %v2240_v12 }
 0x4b3   :  { %v1464_v26 = vpop.f32.mrb[44].mxu0  ;;  %v912_v25 = vmul.f32 %v2245_v16, %v2245_v16 }
 0x4b4   :  { %v873_v62 = vadd.f32 %v1464_v26, %v2109_v6  ;;  %v864_v19 = vpop.f32.mrb[45].mxu0  ;;  %941 = vadd.xlane.f32.xlu1 %v914_v53 }
 0x4b5   :  { %v865_v21 = vadd.f32 %v864_v19, %v2105_v2  ;;  %v1465_v22 = vpop.f32.mrb[46].mxu0  ;;  %v1331_v2 = vld [vmem:[%s2360_s6] ss:$0 sm:$0xff] }
 0x4b6   :  { %v876_v23 = vadd.f32 %v1465_v22, %v2111_v11  ;;  %v867_v24 = vpop.f32.mrb[47].mxu0  ;;  %935 = vadd.xlane.f32.xlu0 %v911_v20  ;;  %v2261_v14 = vadd.f32 %v2179_v28, %v873_v62 }
 0x4b7   :  { %v2257_v5 = vadd.f32 %v2179_v28, %v865_v21  ;;  %v868_v6 = vadd.f32 %v867_v24, %v2107_v4 }
 0x4b8   :  { %937 = vadd.xlane.f32.xlu1 %v912_v25  ;;  %v2272_v8 = vadd.f32 %v2179_v28, %v876_v23  ;;  %v917_v30 = vmul.f32 %v2261_v14, %v2261_v14 }
 0x4b9   :  { %v2264_v63 = vadd.f32 %v2179_v28, %v868_v6  ;;  %v915_v11 = vmul.f32 %v2257_v5, %v2257_v5 }
 0x4ba   :  { %v918_v47 = vmul.f32 %v2272_v8, %v2272_v8 }
 0x4bb   :  { %v1128_v3 = vpop.f32.mrb[48].mxu0  ;;  %943 = vadd.xlane.f32.xlu0 %v915_v11  ;;  %v916_v4 = vmul.f32 %v2264_v63, %v2264_v63 }
 0x4bc   :  { %v1129_v29 = vadd.f32 %v1331_v2, %v1128_v3  ;;  %v1484_v17 = vpop.f32.mrb[49].mxu0 }
 0x4bd   :  { %v1131_v27 = vpop.f32.mrb[50].mxu0  ;;  %945 = vadd.xlane.f32.xlu1 %v916_v4 }
 0x4be   :  { %v1132_v31 = vadd.f32 %v1331_v2, %v1131_v27  ;;  %v1485_v1 = vpop.f32.mrb[51].mxu0  ;;  %v1135_v28 = vmax.f32 %v1129_v29, 0.0 }
 0x4bf   :  { %947 = vadd.xlane.f32.xlu0 %v917_v30 }
 0x4c0   :  { %v1136_v34 = vmax.f32 %v1132_v31, 0.0 }
 0x4c1   :  { %949 = vadd.xlane.f32.xlu1 %v918_v47 }
 0x4c2   :  { %v1137_v36 = vpack.c.bf16 %v1136_v34, %v1135_v28 }
 0x4c4   :  { %1503 = vmatmul.mubr.bf16.vlgmr.msra.gmra.mrb[48].mxu1 %v1137_v36 }
 0x52f   :  { %v924_v42 = vpop.xlane.xlu0 %923 }
 0x530   :  { %v953_v37 = vmax.f32 %v924_v42, 1e-24 }
 0x531   :  { %v926_v35 = vpop.xlane.xlu1 %925 }
 0x532   :  { %1614 = vrsqrt.f32 %v953_v37  ;;  %v954_v43 = vmax.f32 %v926_v35, 1e-24 }
 0x533   :  { %v920_v38 = vpop.xlane.xlu0 %919 }
 0x534   :  { %1616 = vrsqrt.f32 %v954_v43  ;;  %v951_v39 = vmax.f32 %v920_v38, 1e-24 }
 0x535   :  { %v922_v45 = vpop.xlane.xlu1 %921 }
 0x536   :  { %1618 = vrsqrt.f32 %v951_v39  ;;  %v952_v44 = vmax.f32 %v922_v45, 1e-24 }
 0x537   :  { %v932_v40 = vpop.xlane.xlu0 %931 }
 0x538   :  { %1620 = vrsqrt.f32 %v952_v44  ;;  %v957_v13 = vmax.f32 %v932_v40, 1e-24 }
 0x539   :  { %v934_v41 = vpop.xlane.xlu1 %933 }
 0x53a   :  { %1622 = vrsqrt.f32 %v957_v13  ;;  %v958_v50 = vmax.f32 %v934_v41, 1e-24 }
 0x53b   :  { %v928_v54 = vpop.xlane.xlu0 %927 }
 0x53c   :  { %v1615_v48 = vpop.eup %1614  ;;  %1624 = vrsqrt.f32 %v958_v50  ;;  %v955_v55 = vmax.f32 %v928_v54, 1e-24 }
 0x53d   :  { %v985_v57 = vmul.f32 %v1615_v48, %v2184_v15  ;;  %v930_v60 = vpop.xlane.xlu1 %929 }
 0x53e   :  { %v1617_v61 = vpop.eup %1616  ;;  %1626 = vrsqrt.f32 %v955_v55  ;;  %v956_v0 = vmax.f32 %v930_v60, 1e-24 }
 0x53f   :  { %1001 = vst [vmem:[%s2361_s9 + $0x10] sm:$0xff] %v985_v57  ;;  %v986_v58 = vmul.f32 %v1617_v61, %v2192_v32  ;;  %v940_v7 = vpop.xlane.xlu0 %939 }
 0x540   :  { %v1619_v59 = vpop.eup %1618  ;;  %1628 = vrsqrt.f32 %v956_v0  ;;  %v961_v52 = vmax.f32 %v940_v7, 1e-24 }
 0x541   :  { %1002 = vst [vmem:[%s2361_s9 + $0x18] sm:$0xff] %v986_v58  ;;  %v983_v15 = vmul.f32 %v1619_v59, %v2189_v18  ;;  %v942_v53 = vpop.xlane.xlu1 %941 }
 0x542   :  { %v1621_v26 = vpop.eup %1620  ;;  %1630 = vrsqrt.f32 %v961_v52  ;;  %v962_v62 = vmax.f32 %v942_v53, 1e-24 }
 0x543   :  { %999 = vst [vmem:[%s2361_s9] sm:$0xff] %v983_v15  ;;  %v984_v32 = vmul.f32 %v1621_v26, %v2197_v46  ;;  %v936_v19 = vpop.xlane.xlu0 %935 }
 0x544   :  { %v1623_v20 = vpop.eup %1622  ;;  %1632 = vrsqrt.f32 %v962_v62  ;;  %v959_v21 = vmax.f32 %v936_v19, 1e-24 }
 0x545   :  { %1000 = vst [vmem:[%s2361_s9 + $0x8] sm:$0xff] %v984_v32  ;;  %v989_v18 = vmul.f32 %v1623_v20, %v2206_v10  ;;  %v938_v22 = vpop.xlane.xlu1 %937 }
 0x546   :  { %v1625_v23 = vpop.eup %1624  ;;  %1634 = vrsqrt.f32 %v959_v21  ;;  %v960_v24 = vmax.f32 %v938_v22, 1e-24 }
 0x547   :  { %1005 = vst [vmem:[%s2361_s9 + $0x30] sm:$0xff] %v989_v18  ;;  %v990_v46 = vmul.f32 %v1625_v23, %v2216_v51 }
 0x548   :  { %v1627_v25 = vpop.eup %1626  ;;  %1636 = vrsqrt.f32 %v960_v24  ;;  %v944_v6 = vpop.xlane.xlu0 %943 }
 0x549   :  { %1006 = vst [vmem:[%s2361_s9 + $0x38] sm:$0xff] %v990_v46  ;;  %v987_v2 = vmul.f32 %v1627_v25, %v2213_v49  ;;  %v963_v10 = vmax.f32 %v944_v6, 1e-24 }
 0x54a   :  { %v1629_v11 = vpop.eup %1628  ;;  %v946_v3 = vpop.xlane.xlu1 %945 }
 0x54b   :  { %1003 = vst [vmem:[%s2361_s9 + $0x20] sm:$0xff] %v987_v2  ;;  %v988_v4 = vmul.f32 %v1629_v11, %v2221_v33  ;;  %1638 = vrsqrt.f32 %v963_v10  ;;  %v964_v51 = vmax.f32 %v946_v3, 1e-24 }
 0x54c   :  { %v1631_v29 = vpop.eup %1630  ;;  %v948_v17 = vpop.xlane.xlu0 %947 }
 0x54d   :  { %1004 = vst [vmem:[%s2361_s9 + $0x28] sm:$0xff] %v988_v4  ;;  %v993_v27 = vmul.f32 %v1631_v29, %v2230_v56  ;;  %1640 = vrsqrt.f32 %v964_v51  ;;  %v965_v49 = vmax.f32 %v948_v17, 1e-24 }
 0x54e   :  { %v1633_v30 = vpop.eup %1632  ;;  %v950_v31 = vpop.xlane.xlu1 %949 }
 0x54f   :  { %1009 = vst [vmem:[%s2361_s9 + $0x50] sm:$0xff] %v993_v27  ;;  %v994_v33 = vmul.f32 %v1633_v30, %v2240_v12  ;;  %1642 = vrsqrt.f32 %v965_v49  ;;  %v966_v1 = vmax.f32 %v950_v31, 1e-24 }
 0x550   :  { %v1635_v47 = vpop.eup %1634 }
 0x551   :  { %1010 = vst [vmem:[%s2361_s9 + $0x58] sm:$0xff] %v994_v33  ;;  %v991_v28 = vmul.f32 %v1635_v47, %v2237_v9  ;;  %1644 = vrsqrt.f32 %v966_v1 }
 0x552   :  { %v1637_v56 = vpop.eup %1636 }
 0x553   :  { %1007 = vst [vmem:[%s2361_s9 + $0x40] sm:$0xff] %v991_v28  ;;  %v992_v34 = vmul.f32 %v1637_v56, %v2245_v16 }
 0x555   :  { %v1639_v36 = vpop.eup %1638  ;;  %1008 = vst [vmem:[%s2361_s9 + $0x48] sm:$0xff] %v992_v34 }
 0x556   :  { %v995_v12 = vmul.f32 %v1639_v36, %v2257_v5 }
 0x557   :  { %v1641_v42 = vpop.eup %1640 }
 0x558   :  { %1011 = vst [vmem:[%s2361_s9 + $0x60] sm:$0xff] %v995_v12  ;;  %v996_v9 = vmul.f32 %v1641_v42, %v2264_v63  ;;  %v1341_v63 = vld [vmem:[%s2362_s8] ss:$0 sm:$0xff] }
 0x559   :  { %v1643_v37 = vpop.eup %1642 }
 0x55a   :  { %1012 = vst [vmem:[%s2361_s9 + $0x68] sm:$0xff] %v996_v9  ;;  %v997_v16 = vmul.f32 %v1643_v37, %v2261_v14 }
 0x55b   :  { %v1645_v35 = vpop.eup %1644 }
 0x55c   :  { %1013 = vst [vmem:[%s2361_s9 + $0x70] sm:$0xff] %v997_v16  ;;  %v998_v5 = vmul.f32 %v1645_v35, %v2272_v8 }
 0x55e   :  { %1014 = vst [vmem:[%s2361_s9 + $0x78] sm:$0xff] %v998_v5 }
 0x597   :  { %v1243_v43 = vpop.f32.mrb[48].mxu1 }
 0x598   :  { %v1244_v38 = vadd.f32 %v1341_v63, %v1243_v43  ;;  %v1504_v39 = vpop.f32.mrb[49].mxu1 }
 0x599   :  { %v1246_v45 = vpop.f32.mrb[50].mxu1 }
 0x59a   :  { %v1350_v14 = vmul.f32 -1.442695, %v1244_v38  ;;  %v1247_v44 = vadd.f32 %v1341_v63, %v1246_v45  ;;  %v1505_v40 = vpop.f32.mrb[51].mxu1 }
 0x59c   :  { %1646 = vpow2.f32 %v1350_v14  ;;  %v1351_v13 = vmul.f32 -1.442695, %v1247_v44 }
 0x59e   :  { %1648 = vpow2.f32 %v1351_v13 }
 0x5a6   :  { %v1647_v41 = vpop.eup %1646 }
 0x5a7   :  { %v1256_v8 = vadd.f32 1.0, %v1647_v41 }
 0x5a8   :  { %v1649_v50 = vpop.eup %1648 }
 0x5a9   :  { %1650 = vrcp.f32 %v1256_v8  ;;  %v1257_v54 = vadd.f32 1.0, %v1649_v50 }
 0x5ab   :  { %1652 = vrcp.f32 %v1257_v54 }
 0x5b3   :  { %v1651_v48 = vpop.eup %1650 }
 0x5b4   :  { %1262 = vst [vmem:[%s2363_s10] sm:$0xff] %v1651_v48 }
 0x5b5   :  { %v1653_v55 = vpop.eup %1652 }
 0x5b6   :  { %1263 = vst [vmem:[%s2363_s10 + $0x8] sm:$0xff] %v1653_v55 }

</bundles_post_ra>
